<compile_context>
chip_gen: v6e
topology: v6e:2x2x1
jax: 0.10.0
libtpu: 0.0.40
codegen_flags: <defaults>
</compile_context>

<pallas_src>
import math

import jax
import jax.numpy as jnp
from jax.experimental import pallas as pl
from jax.experimental.pallas import tpu as pltpu


def _round_up(x: int, m: int) -> int:
    return ((x + m - 1) // m) * m


def _ceil_div(a: int, b: int) -> int:
    return -(-a // b)


def _vmem_budget_bytes() -> int:
    """Per-core VMEM we allow Mosaic to use (physical capacity minus headroom)."""
    try:
        cap = int(pltpu.get_tpu_info().vmem_capacity_bytes)
    except Exception:  # pragma: no cover - conservative fallback (v7x-sized)
        cap = 64 * 1024 * 1024
    # Leave ~25% for Mosaic internal scratch / pipelining; never ask for >100MiB.
    return min(int(cap * 3 // 4), 100 * 1024 * 1024)


# --------------------------------------------------------------------------- #
# Kernels
# --------------------------------------------------------------------------- #
def _mm_resident_kernel(a_ref, b_ref, o_ref):
    """B fully resident in VMEM: one MXU pass per row tile, no accumulator."""
    a = a_ref[...]
    b = b_ref[...]
    if a.dtype != b.dtype:          # e.g. f32 adj tile -> bf16, fused in-kernel
        a = a.astype(b.dtype)
    o_ref[...] = jnp.dot(a, b, preferred_element_type=jnp.float32).astype(o_ref.dtype)


def _mm_stream_acc_out_kernel(a_ref, b_ref, o_ref):
    """K-tiled path, f32 output: accumulate directly into the resident out block."""
    k = pl.program_id(1)

    @pl.when(k == 0)
    def _init():
        o_ref[...] = jnp.zeros_like(o_ref)

    a = a_ref[...]
    b = b_ref[...]
    if a.dtype != b.dtype:
        a = a.astype(b.dtype)
    o_ref[...] += jnp.dot(a, b, preferred_element_type=jnp.float32)


def _mm_stream_scratch_kernel(a_ref, b_ref, o_ref, acc_ref):
    """K-tiled path, non-f32 output: f32 VMEM accumulator, cast on finalize."""
    k = pl.program_id(1)

    @pl.when(k == 0)
    def _init():
        acc_ref[...] = jnp.zeros_like(acc_ref)

    a = a_ref[...]
    b = b_ref[...]
    if a.dtype != b.dtype:
        a = a.astype(b.dtype)
    acc_ref[...] += jnp.dot(a, b, preferred_element_type=jnp.float32)

    @pl.when(k == pl.num_programs(1) - 1)
    def _finalize():
        o_ref[...] = acc_ref[...].astype(o_ref.dtype)


# --------------------------------------------------------------------------- #
# Tiled matmul wrapper
# --------------------------------------------------------------------------- #
def _tiled_matmul(a, b, *, out_dtype, tm=256, tk=512,
                  max_resident_bytes=None, keep_n_padded=False):
    """out = a @ b via Pallas.

    Row axis is "parallel" (megacore-sharded on v7x).  If B fits in VMEM the K
    grid axis is dropped and B is made resident (read from HBM exactly once);
    otherwise K is an "arbitrary" reduction axis with an output-resident
    accumulator.  A is cast to B's dtype per-tile inside the kernel, so f32
    operands (e.g. the adjacency) need no wrapper-side cast pass.
    """
    m, k_dim = a.shape
    k_dim2, n = b.shape
    assert k_dim == k_dim2, (a.shape, b.shape)

    sub = 16      # sublane multiple (safe for both f32 and bf16 operands)
    lane = 128    # lane multiple

    # --- row tiling: minimize padding, keep >= 2 row tiles for v7x megacore ---
    m_min = _round_up(m, sub)
    num_m = max(1, _ceil_div(m_min, tm))
    if num_m == 1 and m_min >= 2 * sub:
        num_m = 2
    tm_eff = _round_up(_ceil_div(m_min, num_m), sub)
    m_pad = tm_eff * num_m

    n_pad = _round_up(n, lane)           # lane-dense output (unmasked vst)
    k_min = _round_up(k_dim, lane)

    a_item = a.dtype.itemsize
    b_item = b.dtype.itemsize
    out_item = jnp.dtype(out_dtype).itemsize
    out_is_f32 = jnp.dtype(out_dtype) == jnp.dtype(jnp.float32)

    budget = _vmem_budget_bytes()
    if max_resident_bytes is None:
        max_resident_bytes = budget

    # --- fast path decision: can B live fully in VMEM? ------------------------
    resident_need = (2 * tm_eff * k_min * a_item      # double-buffered A tiles
                     + 2 * k_min * n_pad * b_item     # B (conservatively x2)
                     + 2 * tm_eff * n_pad * out_item) # double-buffered out tiles
    use_resident = int(resident_need * 5 // 4) <= max_resident_bytes

    if use_resident:
        tk_eff = k_min
        num_k = 1
        k_pad = k_min
    else:
        num_k = max(1, _ceil_div(k_min, tk))
        tk_eff = _round_up(_ceil_div(k_min, num_k), lane)
        k_pad = tk_eff * num_k

    # --- pad only when actually required (no-op passes are never emitted) -----
    a_p = a
    if m_pad != m or k_pad != k_dim:
        a_p = jnp.pad(a, ((0, m_pad - m), (0, k_pad - k_dim)))
    b_p = b
    if k_pad != k_dim or n_pad != n:
        b_p = jnp.pad(b, ((0, k_pad - k_dim), (0, n_pad - n)))

    # --- VMEM limit & cost estimate -------------------------------------------
    if use_resident:
        vmem_need = resident_need
        bytes_accessed = (m_pad * k_pad * a_item
                          + k_pad * n_pad * b_item
                          + m_pad * n_pad * out_item)
    else:
        vmem_need = (2 * tm_eff * tk_eff * a_item
                     + 2 * tk_eff * n_pad * b_item
                     + 2 * tm_eff * n_pad * out_item)
        if not out_is_f32:
            vmem_need += tm_eff * n_pad * 4
        # B is re-streamed once per row tile in this path.
        bytes_accessed = (m_pad * k_pad * a_item
                          + num_m * k_pad * n_pad * b_item
                          + m_pad * n_pad * out_item)

    vmem_limit = min(budget, max(int(vmem_need * 3 // 2), 16 * 1024 * 1024))
    cost = pl.CostEstimate(flops=2 * m_pad * k_pad * n_pad,
                           transcendentals=0,
                           bytes_accessed=bytes_accessed)

    # --- build the pallas_call -------------------------------------------------
    if use_resident:
        grid_spec = pltpu.PrefetchScalarGridSpec(
            num_scalar_prefetch=0,
            grid=(num_m,),
            in_specs=[
                pl.BlockSpec((tm_eff, k_pad), lambda i: (i, 0)),   # A row tile
                pl.BlockSpec((k_pad, n_pad), lambda i: (0, 0)),    # B resident
            ],
            out_specs=pl.BlockSpec((tm_eff, n_pad), lambda i: (i, 0)),
            scratch_shapes=[],
        )
        kernel = _mm_resident_kernel
        dim_sem = ("parallel",)
    else:
        in_specs = [
            pl.BlockSpec((tm_eff, tk_eff), lambda i, kk: (i, kk)),  # A row/K tile
            pl.BlockSpec((tk_eff, n_pad), lambda i, kk: (kk, 0)),   # B K tile
        ]
        out_spec = pl.BlockSpec((tm_eff, n_pad), lambda i, kk: (i, 0))
        if out_is_f32:
            kernel = _mm_stream_acc_out_kernel
            scratch = []
        else:
            kernel = _mm_stream_scratch_kernel
            scratch = [pltpu.VMEM((tm_eff, n_pad), jnp.float32)]
        grid_spec = pltpu.PrefetchScalarGridSpec(
            num_scalar_prefetch=0,
            grid=(num_m, num_k),
            in_specs=in_specs,
            out_specs=out_spec,
            scratch_shapes=scratch,
        )
        dim_sem = ("parallel", "arbitrary")

    out_p = pl.pallas_call(
        kernel,
        out_shape=jax.ShapeDtypeStruct((m_pad, n_pad), out_dtype),
        grid_spec=grid_spec,
        compiler_params=pltpu.CompilerParams(
            dimension_semantics=dim_sem,
            vmem_limit_bytes=vmem_limit,
        ),
        cost_estimate=cost,
    )(a_p, b_p)

    if keep_n_padded:
        return out_p[:m, :]
    return out_p[:m, :n]


# --------------------------------------------------------------------------- #
# GCN layer forward
# --------------------------------------------------------------------------- #
def graph_convolution(x, weight, adj, *, compute_dtype=jnp.bfloat16,
                      tm=256, tk=512, max_resident_bytes=None):
    """GCN layer forward: output = adj @ (x @ weight), f32 output.

    x / weight are pre-cast to `compute_dtype` (they are small); the N x N
    adjacency is left untouched in HBM and cast per-tile inside the kernel.
    """
    n_nodes, f_in = x.shape
    f_in_w, f_out = weight.shape
    assert f_in == f_in_w
    assert adj.shape == (n_nodes, n_nodes)

    x_c = x.astype(compute_dtype)
    w_c = weight.astype(compute_dtype)

    # support = x @ weight  (kept lane-padded so the second matmul re-pads nothing)
    support = _tiled_matmul(x_c, w_c, out_dtype=compute_dtype, tm=tm, tk=tk,
                            max_resident_bytes=max_resident_bytes,
                            keep_n_padded=True)

    # output = adj @ support  (adj stays f32 in HBM; f32 accumulation & output)
    out = _tiled_matmul(adj, support, out_dtype=jnp.float32, tm=tm, tk=tk,
                        max_resident_bytes=max_resident_bytes)
    return out[:, :f_out]


def init_gcn_weight(key, in_features, out_features, dtype=jnp.float32):
    """Matches GraphConvolution.reset_parameters: U(-stdv, stdv), stdv=1/sqrt(F_out)."""
    stdv = 1.0 / math.sqrt(out_features)
    return jax.random.uniform(
        key, (in_features, out_features), dtype=dtype, minval=-stdv, maxval=stdv
    )


if __name__ == "__main__":
    key = jax.random.PRNGKey(0)

    def make_problem(k, n_nodes, f_in, f_out):
        k_w, k_x, k_a = jax.random.split(k, 3)
        w = init_gcn_weight(k_w, f_in, f_out)
        x = jax.random.normal(k_x, (n_nodes, f_in), dtype=jnp.float32)
        raw = jax.random.uniform(k_a, (n_nodes, n_nodes), dtype=jnp.float32)
        adj = (raw + raw.T) * 0.5 + jnp.eye(n_nodes, dtype=jnp.float32)
        adj = adj / jnp.sum(adj, axis=1, keepdims=True)
        return x, w, adj

    k1, k2 = jax.random.split(key)

    # 1) Toy shapes from the module demo (8 nodes, 32 -> 16); resident fast path.
    x, w, adj = make_problem(k1, 8, 32, 16)
    ref = adj @ (x @ w)
    out = jax.block_until_ready(
        graph_convolution(x, w, adj, compute_dtype=jnp.float32)
    )
    assert out.shape == (8, 16)
    assert jnp.allclose(out, ref, atol=1e-4, rtol=1e-4)

    out_bf = jax.block_until_ready(
        graph_convolution(x, w, adj, compute_dtype=jnp.bfloat16)
    )
    assert jnp.allclose(out_bf, ref, atol=3e-2, rtol=3e-2)

    # 2) Larger problem (256 nodes, 128 -> 64): resident path, f32 and bf16.
    x2, w2, adj2 = make_problem(k2, 256, 128, 64)
    ref2 = adj2 @ (x2 @ w2)

    out2_f32 = jax.block_until_ready(
        graph_convolution(x2, w2, adj2, compute_dtype=jnp.float32)
    )
    assert out2_f32.shape == (256, 64)
    assert jnp.allclose(out2_f32, ref2, atol=1e-3, rtol=1e-3)

    out2_bf16 = jax.block_until_ready(
        graph_convolution(x2, w2, adj2, compute_dtype=jnp.bfloat16)
    )
    assert jnp.allclose(out2_bf16, ref2, atol=3e-2, rtol=3e-2)

    # 3) Force the streamed (K-tiled) fallback path to exercise the accumulator
    #    kernels (scratch kernel for bf16 output, accumulate-into-output for f32).
    out2_stream = jax.block_until_ready(
        graph_convolution(x2, w2, adj2, compute_dtype=jnp.bfloat16,
                          tm=128, tk=128, max_resident_bytes=0)
    )
    assert jnp.allclose(out2_stream, ref2, atol=3e-2, rtol=3e-2)

    print("KERNEL_OK")
</pallas_src>

<mosaic_0001>
module attributes {stable_mosaic.version = 11 : i64} {
  func.func @_mm_resident_kernel(%arg0: i32, %arg1: memref<16x128xf32, #tpu.memory_space<vmem>>, %arg2: memref<128x128xf32, #tpu.memory_space<vmem>>, %arg3: memref<16x128xf32, #tpu.memory_space<vmem>>) attributes {dimension_semantics = [#tpu.dimension_semantics<parallel>], iteration_bounds = array<i64: 1>, scalar_prefetch = 0 : i64, scratch_operands = 0 : i64, tpu.core_type = #tpu.core_type<tc>, window_params = [{transform_indices = @transform_0, window_bounds = array<i64: 16, 128>}, {pipeline_mode = #tpu.pipeline_mode<synchronous>, transform_indices = @transform_1, window_bounds = array<i64: 128, 128>}, {transform_indices = @transform_2, window_bounds = array<i64: 16, 128>}]} {
    %c0 = arith.constant 0 : index
    %c0_0 = arith.constant 0 : index
    %0 = vector.load %arg1[%c0, %c0_0] : memref<16x128xf32, #tpu.memory_space<vmem>>, vector<16x128xf32>
    %c0_1 = arith.constant 0 : index
    %c0_2 = arith.constant 0 : index
    %1 = vector.load %arg2[%c0_1, %c0_2] : memref<128x128xf32, #tpu.memory_space<vmem>>, vector<128x128xf32>
    %cst = arith.constant dense<0.000000e+00> : vector<16x128xf32>
    %2 = tpu.matmul %0, %1, %cst {dimension_numbers = #tpu.dot_dimension_numbers<[1], [0], [0], [1], [0, 0, 1, 1], [], []>} : vector<16x128xf32>, vector<128x128xf32>, vector<16x128xf32> -> vector<16x128xf32>
    %c0_3 = arith.constant 0 : index
    %c0_4 = arith.constant 0 : index
    %3 = vector.load %arg3[%c0_3, %c0_4] : memref<16x128xf32, #tpu.memory_space<vmem>>, vector<16x128xf32>
    tpu.vector_store %arg3[%c0_3, %c0_4], %2 {strides = array<i32>} : memref<16x128xf32, #tpu.memory_space<vmem>>, vector<16x128xf32>,
    return
  }
  func.func @transform_0(%arg0: i32) -> (i32, i32) {
    %c0_i32 = arith.constant 0 : i32
    %c0_i32_0 = arith.constant 0 : i32
    return %arg0, %c0_i32 : i32, i32
  }
  func.func @transform_1(%arg0: i32) -> (i32, i32) {
    %c0_i32 = arith.constant 0 : i32
    %c0_i32_0 = arith.constant 0 : i32
    %c0_i32_1 = arith.constant 0 : i32
    return %c0_i32, %c0_i32_0 : i32, i32
  }
  func.func @transform_2(%arg0: i32) -> (i32, i32) {
    %c0_i32 = arith.constant 0 : i32
    %c0_i32_0 = arith.constant 0 : i32
    return %arg0, %c0_i32 : i32, i32
  }
}

</mosaic_0001>

<bundles_post_ra>
// kernel: tpu_custom_call.1
= control target key start
LH: loop header
LB: loop body
LE: loop exit
PB: predicated region body
PF: predicated region fallthrough
CT: control target
= control target key end

     0   :  { %7 = vsyncpa [#allocation3], 0  ;;  %s315_s0 = inlined_call_operand.hbm [shape: f32[16,128], index: 0, kind: input, shape index: {}]   ;;  %s316_s1 = inlined_call_operand.hbm [shape: f32[128,128], index: 1, kind: input, shape index: {}]   ;;  %s317_s2 = inlined_call_operand.hbm [shape: f32[16,128], index: 2, kind: output, shape index: {}]  }
   0x1   :  { %8 = vsyncpa [#allocation6], 0 }
   0x2   :  { %9 = vsyncpa [#allocation4], 0  ;;  %s277_s9 = smov [#allocation2]  }
   0x3   :  { %s15_s10 = sshll.u32 %s277_s9, 4  ;;  %s16_s10 = int_to_ptr.vmem [resolvable:$true] %s15_s10 }
   0x4   :  { %s219_s11 = scalar_lea.vmem %s16_s10, 256  ;;  %p224_p1 = scmp.lt.s32.totalorder %s16_s10, %s16_s10 }
   0x5   :  { %p220_p0 = scmp.ne.s32.totalorder %s16_s10, %s219_s11  ;;  %p225_p2 = scmp.lt.s32.totalorder %s219_s11, %s219_s11 }
   0x7   :  { %p226_p3 = por %p225_p2, %p224_p1 }
   0x9   :  { %p227_p4 = pnand %p226_p3, %p220_p0 }
   0xb   :  { %230 = shalt.err (!%p227_p4)
}
   0xc   :  { %s278_s12 = smov 128   ;;  %s279_s13 = smov 8  }
   0xd   :  { %21 = dma.hbm_to_vmem [thread:$0]  %s315_s0, 256, %s16_s10, [#allocation3], %s278_s12, %s278_s12, %s279_s13  }
   0xe   :  { %s280_s16 = smov [#allocation5]  }
   0xf   :  { %s27_s17 = sshll.u32 %s280_s16, 4  ;;  %s28_s17 = int_to_ptr.vmem [resolvable:$true] %s27_s17 }
  0x10   :  { %s239_s18 = scalar_lea.vmem %s28_s17, 2048  ;;  %p244_p6 = scmp.lt.s32.totalorder %s28_s17, %s28_s17 }
  0x11   :  { %p240_p5 = scmp.ne.s32.totalorder %s28_s17, %s239_s18  ;;  %p245_p7 = scmp.lt.s32.totalorder %s239_s18, %s239_s18 }
  0x13   :  { %p246_p8 = por %p245_p7, %p244_p6 }
  0x15   :  { %p247_p9 = pnand %p246_p8, %p240_p5 }
  0x17   :  { %250 = shalt.err (!%p247_p9)
}
  0x18   :  { %33 = dma.hbm_to_vmem [thread:$0]  %s316_s1, 2048, %s28_s17, [#allocation6], %s278_s12, %s278_s12, %s279_s13  }
  0x19   :  { %271 = dma.done.wait [#allocation3], 256  }
  0x1a   :  { %272 = vsyncadd [#allocation3], 4294967040 }
  0x1b   :  { %273 = dma.done.wait [#allocation6], 2048  }
  0x1c   :  { %274 = vsyncadd [#allocation6], 4294965248  ;;  %v57_v0 = vld [vmem:[#allocation5 + $0x78] sm:$0xff]  ;;  %v56_v1 = vld [vmem:[#allocation5 + $0x70] sm:$0xff]  ;;  %s281_s0 = smov [#allocation7]  }
  0x1d   :  { %171 = vmatprep.subr.mxu0 %v57_v0  ;;  %v55_v2 = vld [vmem:[#allocation5 + $0x68] sm:$0xff]  ;;  %v54_v3 = vld [vmem:[#allocation5 + $0x60] sm:$0xff]  ;;  %v40_v4 = vld [vmem:[#allocation2] sm:$0xff]  ;;  %s140_s1 = sshll.u32 %s281_s0, 4  ;;  %s141_s1 = int_to_ptr.vmem [resolvable:$true] %s140_s1 }
  0x1e   :  { %172 = vmatpush3.msra.mxu0 %v57_v0  ;;  %v53_v5 = vld [vmem:[#allocation5 + $0x58] sm:$0xff]  ;;  %203 = vmatprep.mubr.f32.mxu0 %v40_v4  ;;  %v52_v6 = vld [vmem:[#allocation5 + $0x50] sm:$0xff]  ;;  %v51_v7 = vld [vmem:[#allocation5 + $0x48] sm:$0xff]  ;;  %s251_s21 = scalar_lea.vmem %s141_s1, 256  ;;  %p256_p11 = scmp.lt.s32.totalorder %s141_s1, %s141_s1 }
  0x1f   :  { %173 = vmatprep.subr.mxu0 %v56_v1  ;;  %v50_v8 = vld [vmem:[#allocation5 + $0x40] sm:$0xff]  ;;  %v49_v9 = vld [vmem:[#allocation5 + $0x38] sm:$0xff]  ;;  %v48_v10 = vld [vmem:[#allocation5 + $0x30] sm:$0xff]  ;;  %p252_p10 = scmp.ne.s32.totalorder %s141_s1, %s251_s21  ;;  %p257_p12 = scmp.lt.s32.totalorder %s251_s21, %s251_s21 }
  0x20   :  { %174 = vmatpush3.msra.mxu0 %v56_v1  ;;  %v47_v11 = vld [vmem:[#allocation5 + $0x28] sm:$0xff]  ;;  %v46_v12 = vld [vmem:[#allocation5 + $0x20] sm:$0xff]  ;;  %v45_v13 = vld [vmem:[#allocation5 + $0x18] sm:$0xff] }
  0x21   :  { %175 = vmatprep.subr.mxu0 %v55_v2  ;;  %v44_v14 = vld [vmem:[#allocation5 + $0x10] sm:$0xff]  ;;  %v43_v15 = vld [vmem:[#allocation5 + $0x8] sm:$0xff]  ;;  %v42_v16 = vld [vmem:[#allocation5] sm:$0xff]  ;;  %p258_p13 = por %p257_p12, %p256_p11 }
  0x22   :  { %176 = vmatpush3.msra.mxu0 %v55_v2  ;;  %v41_v17 = vld [vmem:[#allocation2 + $0x8] sm:$0xff] }
  0x23   :  { %177 = vmatprep.subr.mxu0 %v54_v3  ;;  %p259_p0 = pnand %p258_p13, %p252_p10 }
  0x24   :  { %178 = vmatpush3.msra.mxu0 %v54_v3 }
  0x25   :  { %179 = vmatprep.subr.mxu0 %v53_v5 }
  0x26   :  { %180 = vmatpush3.msra.mxu0 %v53_v5 }
  0x27   :  { %181 = vmatprep.subr.mxu0 %v52_v6 }
  0x28   :  { %182 = vmatpush3.msra.mxu0 %v52_v6 }
  0x29   :  { %183 = vmatprep.subr.mxu0 %v51_v7 }
  0x2a   :  { %184 = vmatpush3.msra.mxu0 %v51_v7 }
  0x2b   :  { %185 = vmatprep.subr.mxu0 %v50_v8 }
  0x2c   :  { %186 = vmatpush3.msra.mxu0 %v50_v8 }
  0x2d   :  { %187 = vmatprep.subr.mxu0 %v49_v9 }
  0x2e   :  { %188 = vmatpush3.msra.mxu0 %v49_v9 }
  0x2f   :  { %189 = vmatprep.subr.mxu0 %v48_v10 }
  0x30   :  { %190 = vmatpush3.msra.mxu0 %v48_v10 }
  0x31   :  { %191 = vmatprep.subr.mxu0 %v47_v11 }
  0x32   :  { %192 = vmatpush3.msra.mxu0 %v47_v11 }
  0x33   :  { %193 = vmatprep.subr.mxu0 %v46_v12 }
  0x34   :  { %194 = vmatpush3.msra.mxu0 %v46_v12 }
  0x35   :  { %195 = vmatprep.subr.mxu0 %v45_v13 }
  0x36   :  { %196 = vmatpush3.msra.mxu0 %v45_v13 }
  0x37   :  { %197 = vmatprep.subr.mxu0 %v44_v14 }
  0x38   :  { %198 = vmatpush3.msra.mxu0 %v44_v14 }
  0x39   :  { %199 = vmatprep.subr.mxu0 %v43_v15 }
  0x3a   :  { %200 = vmatpush3.msra.mxu0 %v43_v15 }
  0x3b   :  { %201 = vmatprep.subr.mxu0 %v42_v16 }
  0x3c   :  { %202 = vmatpush3.msra.mxu0 %v42_v16 }
  0x3d   :  { %204 = vmatmul.mubr.f32.vlgmr.msra.gmra.mxu0 %v41_v17 }
  0xfd   :  { %v205_v18 = vpop.f32.mrf.mxu0 }
  0xfe   :  { %134 = vst [vmem:[#allocation7 + $0x8] sm:$0xff] %v205_v18 }
  0xff   :  { %v124_v19 = vpop.f32.mrf.mxu0 }
 0x100   :  { %133 = vst [vmem:[#allocation7] sm:$0xff] %v124_v19 }
 0x101   :  { %262 = shalt.err (!%p259_p0)
}
 0x102   :  { %146 = dma.vmem_to_hbm [thread:$0]  %s141_s1, 256, %s317_s2, [#allocation4], %s278_s12, %s278_s12, %s279_s13  }
 0x103   :  { %275 = dma.done.wait [#allocation4], 256  }
 0x104   :  { %276 = vsyncadd [#allocation4], 4294967040 }
 0x105   :  { %150 = vsyncpa [#allocation3], 1 }
 0x106   :  { %151 = vsyncpa [#allocation6], 1 }
 0x107   :  { %152 = vsyncpa [#allocation4], 1 }

</bundles_post_ra>
